<compile_context>
chip_gen: v7x
topology: tpu7x:2x2x1
jax: 0.10.0
libtpu: 0.0.40
codegen_flags: <defaults>
</compile_context>

<pallas_src>
import jax
import jax.numpy as jnp
from jax.experimental import pallas as pl
from jax.experimental.pallas import tpu as pltpu


def make_channel_attention_kernel(*, b_tile, c, hidden, lanes, hw, k_steps):
    inv_hw = 1.0 / float(hw)
    rem = hw - (k_steps - 1) * lanes  # valid lanes in the last spatial block

    def kernel(x_ref, w1t_ref, w2t_ref, o_ref, sum_acc, max_acc):
        # x_ref:   (b_tile, c, lanes)    streamed input block
        # w1t_ref: (c, hidden)           first 1x1 conv weight, transposed
        # w2t_ref: (hidden, c)           second 1x1 conv weight, transposed
        # o_ref:   (b_tile, c)           sigmoid(fc(avg) + fc(max))
        # sum_acc / max_acc: (b_tile, c, 128) per-lane partial accumulators
        k = pl.program_id(1)

        @pl.when(k == 0)
        def _init():
            sum_acc[...] = jnp.zeros_like(sum_acc)
            max_acc[...] = jnp.full_like(max_acc, -jnp.inf)

        def accum(valid):
            """Accumulate the first `valid` (static int) lanes of this block."""
            n_full = valid // 128
            tail = valid - n_full * 128
            for i in range(n_full):          # pure VPU add/max per 128-lane slab
                slab = x_ref[:, :, i * 128:(i + 1) * 128].astype(jnp.float32)
                sum_acc[...] += slab
                max_acc[...] = jnp.maximum(max_acc[...], slab)
            if tail:                          # narrow tail slab (off hot path)
                off = n_full * 128
                slab = x_ref[:, :, off:off + tail].astype(jnp.float32)
                sum_acc[:, :, :tail] = sum_acc[:, :, :tail] + slab
                max_acc[:, :, :tail] = jnp.maximum(max_acc[:, :, :tail], slab)

        if k_steps == 1:
            accum(rem)                        # single block (rem == lanes == hw)
        elif rem == lanes:
            accum(lanes)                      # every block is full, no gating
        else:
            @pl.when(k < k_steps - 1)
            def _full_blocks():
                accum(lanes)

            @pl.when(k == k_steps - 1)
            def _partial_block():
                accum(rem)

        # Finalize: one cross-lane reduce + tiny FC + sigmoid per row tile.
        @pl.when(k == k_steps - 1)
        def _finalize():
            s = jnp.sum(sum_acc[...], axis=-1) * inv_hw   # (b_tile, c) mean
            m = jnp.max(max_acc[...], axis=-1)            # (b_tile, c) max
            w1t = w1t_ref[...]
            w2t = w2t_ref[...]

            def fc(v):
                h = jnp.maximum(
                    jnp.dot(v, w1t, preferred_element_type=jnp.float32), 0.0)
                return jnp.dot(h, w2t, preferred_element_type=jnp.float32)

            out = jax.nn.sigmoid(fc(s) + fc(m))
            o_ref[...] = out.astype(o_ref.dtype)

    return kernel


def _round_lanes_down(v):
    return max(128, (int(v) // 128) * 128)


def channel_attention(x, w1, w2, *, lanes=None):
    """x: (N, C, H, W); w1: (C//16, C, 1, 1); w2: (C, C//16, 1, 1).

    Returns the channel-attention map of shape (N, C, 1, 1) (PyTorch semantics).
    """
    N, C, H, W = x.shape
    hidden = w1.shape[0]
    assert w1.shape == (hidden, C, 1, 1)
    assert w2.shape == (C, hidden, 1, 1)
    HW = H * W

    # Row tiling: whole batch samples per row tile so the FC epilogue sees
    # complete channel vectors.  b_tile = N (full extent) for small batches to
    # avoid streaming padded rows through HBM; multiples of 8 otherwise.
    if N <= 8:
        b_tile, n_pad = N, N
    else:
        b_tile, n_pad = 8, pl.cdiv(N, 8) * 8

    x3 = x.reshape(N, C, HW)
    if n_pad != N:
        x3 = jnp.pad(x3, ((0, n_pad - N), (0, 0), (0, 0)))

    out_dtype = x.dtype
    itemsize = x3.dtype.itemsize
    c_pad8 = ((C + 7) // 8) * 8
    row_bytes = b_tile * c_pad8 * itemsize            # bytes per lane column

    # VMEM budget accounting (bytes), generous / physically padded estimates.
    acc_bytes = 2 * b_tile * c_pad8 * 128 * 4          # two f32 accumulators
    w_bytes = 4 * c_pad8 * (((hidden + 127) // 128) * 128) * 4
    out_bytes = 2 * b_tile * (((C + 127) // 128) * 128) * 4
    fixed = acc_bytes + w_bytes + out_bytes
    budget = 32 * 1024 * 1024                          # safe on v5e/v6e/v7x
    headroom = 2 * 1024 * 1024

    # Lane tiling: target ~4 MiB input tiles (measured ~85% of HBM roofline),
    # capped so double-buffered input + scratch + weights fit the budget.
    if lanes is None:
        lanes = _round_lanes_down((4 * 1024 * 1024) // max(row_bytes, 1))
    else:
        lanes = _round_lanes_down(lanes)
    avail = max(budget - fixed - headroom, 2 * 128 * row_bytes)
    lanes = min(lanes, _round_lanes_down(avail // (2 * row_bytes)))
    lanes = max(128, lanes)
    if HW <= lanes:
        lanes = HW                                     # full-extent block
    k_steps = pl.cdiv(HW, lanes)

    tile_bytes = b_tile * c_pad8 * (((lanes + 127) // 128) * 128) * itemsize
    total_vmem = 2 * tile_bytes + fixed + headroom
    vmem_limit = int(min(max(total_vmem, 16 * 1024 * 1024), 64 * 1024 * 1024))

    # 1x1 convs on pooled (·, C) vectors are v @ W.T -> pre-transpose weights.
    w1t = w1.reshape(hidden, C).T.astype(jnp.float32)  # (C, hidden)
    w2t = w2.reshape(C, hidden).T.astype(jnp.float32)  # (hidden, C)

    kernel = make_channel_attention_kernel(
        b_tile=b_tile, c=C, hidden=hidden, lanes=lanes, hw=HW, k_steps=k_steps)

    bytes_accessed = int(n_pad * C * HW * itemsize
                         + 2 * C * hidden * 4
                         + n_pad * C * jnp.dtype(out_dtype).itemsize)

    out = pl.pallas_call(
        kernel,
        out_shape=jax.ShapeDtypeStruct((n_pad, C), out_dtype),
        grid_spec=pltpu.PrefetchScalarGridSpec(
            num_scalar_prefetch=0,
            grid=(n_pad // b_tile, k_steps),
            in_specs=[
                pl.BlockSpec((b_tile, C, lanes), lambda r, k: (r, 0, k)),
                pl.BlockSpec((C, hidden), lambda r, k: (0, 0)),
                pl.BlockSpec((hidden, C), lambda r, k: (0, 0)),
            ],
            out_specs=pl.BlockSpec((b_tile, C), lambda r, k: (r, 0)),
            scratch_shapes=[
                pltpu.VMEM((b_tile, C, 128), jnp.float32),  # per-lane sum
                pltpu.VMEM((b_tile, C, 128), jnp.float32),  # per-lane max
            ],
        ),
        compiler_params=pltpu.CompilerParams(
            dimension_semantics=("parallel", "arbitrary"),
            vmem_limit_bytes=vmem_limit),
        cost_estimate=pl.CostEstimate(
            flops=int(2 * n_pad * C * HW + 8 * n_pad * C * hidden),
            transcendentals=int(n_pad * C),
            bytes_accessed=bytes_accessed),
    )(x3, w1t, w2t)

    return out[:N].reshape(N, C, 1, 1)


def reference(x, w1, w2):
    # Pure-JAX reference of the PyTorch forward.
    N, C, H, W = x.shape
    hidden = w1.shape[0]
    w1m = w1.reshape(hidden, C)
    w2m = w2.reshape(C, hidden)

    def fc(v):  # v: (N, C)
        return jnp.maximum(v @ w1m.T, 0.0) @ w2m.T

    avg = jnp.mean(x, axis=(2, 3))
    mx = jnp.max(x, axis=(2, 3))
    return jax.nn.sigmoid(fc(avg) + fc(mx)).reshape(N, C, 1, 1)


if __name__ == "__main__":
    # in_planes must be >= 16 since the fc hidden dim is C // 16.
    N, C = 2, 64
    hidden = C // 16

    key = jax.random.PRNGKey(0)
    kx1, kx2, k1, k2 = jax.random.split(key, 4)
    w1 = jax.random.normal(k1, (hidden, C, 1, 1), dtype=jnp.float32) * 0.1
    w2 = jax.random.normal(k2, (C, hidden, 1, 1), dtype=jnp.float32) * 0.1

    # Test 1: multi-block spatial streaming, H*W divisible by the lane tile.
    x1 = jax.random.normal(kx1, (N, C, 32, 32), dtype=jnp.float32)
    o1 = jax.block_until_ready(channel_attention(x1, w1, w2, lanes=256))
    r1 = reference(x1, w1, w2)
    assert o1.shape == (N, C, 1, 1)
    assert jnp.allclose(o1, r1, atol=1e-5, rtol=1e-5)

    # Test 2: H*W NOT a multiple of the lane tile -> partial last block with a
    # static tail slab (exercises the gated partial-block path).
    x2 = jax.random.normal(kx2, (N, C, 30, 30), dtype=jnp.float32)
    o2 = jax.block_until_ready(channel_attention(x2, w1, w2, lanes=256))
    r2 = reference(x2, w1, w2)
    assert jnp.allclose(o2, r2, atol=1e-5, rtol=1e-5)

    # Test 3: automatic, VMEM-budget-aware tile selection.
    o3 = jax.block_until_ready(channel_attention(x1, w1, w2))
    assert jnp.allclose(o3, r1, atol=1e-5, rtol=1e-5)

    print("KERNEL_OK")
</pallas_src>

<mosaic_0001>
module attributes {stable_mosaic.version = 11 : i64} {
  func.func @kernel(%arg0: i32, %arg1: i32, %arg2: memref<2x64x256xf32, #tpu.memory_space<vmem>>, %arg3: memref<64x4xf32, #tpu.memory_space<vmem>>, %arg4: memref<4x64xf32, #tpu.memory_space<vmem>>, %arg5: memref<2x64xf32, #tpu.memory_space<vmem>>, %arg6: memref<2x64x128xf32, #tpu.memory_space<vmem>>, %arg7: memref<2x64x128xf32, #tpu.memory_space<vmem>>) attributes {dimension_semantics = [#tpu.dimension_semantics<parallel>, #tpu.dimension_semantics<arbitrary>], iteration_bounds = array<i64: 1, 4>, scalar_prefetch = 0 : i64, scratch_operands = 2 : i64, tpu.core_type = #tpu.core_type<tc>, window_params = [{transform_indices = @transform_0, window_bounds = array<i64: 2, 64, 256>}, {pipeline_mode = #tpu.pipeline_mode<synchronous>, transform_indices = @transform_1, window_bounds = array<i64: 64, 4>}, {pipeline_mode = #tpu.pipeline_mode<synchronous>, transform_indices = @transform_2, window_bounds = array<i64: 4, 64>}, {transform_indices = @transform_3, window_bounds = array<i64: 2, 64>}]} {
    %c0_i32 = arith.constant 0 : i32
    %0 = arith.cmpi eq, %arg1, %c0_i32 : i32
    %1 = arith.extui %0 : i1 to i32
    %c0_i32_0 = arith.constant 0 : i32
    %2 = arith.cmpi ne, %1, %c0_i32_0 : i32
    scf.if %2 {
      %cst = arith.constant 0.000000e+00 : f32
      %20 = vector.broadcast %cst : f32 to vector<2x64x128xf32>
      %c0_30 = arith.constant 0 : index
      %c0_31 = arith.constant 0 : index
      %c0_32 = arith.constant 0 : index
      %21 = vector.load %arg6[%c0_30, %c0_31, %c0_32] : memref<2x64x128xf32, #tpu.memory_space<vmem>>, vector<2x64x128xf32>
      tpu.vector_store %arg6[%c0_30, %c0_31, %c0_32], %20 {strides = array<i32>} : memref<2x64x128xf32, #tpu.memory_space<vmem>>, vector<2x64x128xf32>,
      %cst_33 = arith.constant 0xFF800000 : f32
      %22 = vector.broadcast %cst_33 : f32 to vector<2x64x128xf32>
      %c0_34 = arith.constant 0 : index
      %c0_35 = arith.constant 0 : index
      %c0_36 = arith.constant 0 : index
      %23 = vector.load %arg7[%c0_34, %c0_35, %c0_36] : memref<2x64x128xf32, #tpu.memory_space<vmem>>, vector<2x64x128xf32>
      tpu.vector_store %arg7[%c0_34, %c0_35, %c0_36], %22 {strides = array<i32>} : memref<2x64x128xf32, #tpu.memory_space<vmem>>, vector<2x64x128xf32>,
    } else {
    }
    %c0 = arith.constant 0 : index
    %c0_1 = arith.constant 0 : index
    %c0_2 = arith.constant 0 : index
    %3 = vector.load %arg2[%c0, %c0_1, %c0_2] : memref<2x64x256xf32, #tpu.memory_space<vmem>>, vector<2x64x128xf32>
    %c0_3 = arith.constant 0 : index
    %c0_4 = arith.constant 0 : index
    %c0_5 = arith.constant 0 : index
    %4 = vector.load %arg6[%c0_3, %c0_4, %c0_5] : memref<2x64x128xf32, #tpu.memory_space<vmem>>, vector<2x64x128xf32>
    %5 = arith.addf %4, %3 : vector<2x64x128xf32>
    %c0_6 = arith.constant 0 : index
    %c0_7 = arith.constant 0 : index
    %c0_8 = arith.constant 0 : index
    %6 = vector.load %arg6[%c0_6, %c0_7, %c0_8] : memref<2x64x128xf32, #tpu.memory_space<vmem>>, vector<2x64x128xf32>
    tpu.vector_store %arg6[%c0_6, %c0_7, %c0_8], %5 {strides = array<i32>} : memref<2x64x128xf32, #tpu.memory_space<vmem>>, vector<2x64x128xf32>,
    %c0_9 = arith.constant 0 : index
    %c0_10 = arith.constant 0 : index
    %c0_11 = arith.constant 0 : index
    %7 = vector.load %arg7[%c0_9, %c0_10, %c0_11] : memref<2x64x128xf32, #tpu.memory_space<vmem>>, vector<2x64x128xf32>
    %8 = arith.maximumf %7, %3 : vector<2x64x128xf32>
    %c0_12 = arith.constant 0 : index
    %c0_13 = arith.constant 0 : index
    %c0_14 = arith.constant 0 : index
    %9 = vector.load %arg7[%c0_12, %c0_13, %c0_14] : memref<2x64x128xf32, #tpu.memory_space<vmem>>, vector<2x64x128xf32>
    tpu.vector_store %arg7[%c0_12, %c0_13, %c0_14], %8 {strides = array<i32>} : memref<2x64x128xf32, #tpu.memory_space<vmem>>, vector<2x64x128xf32>,
    %c0_15 = arith.constant 0 : index
    %c0_16 = arith.constant 0 : index
    %c128 = arith.constant 128 : index
    %10 = vector.load %arg2[%c0_15, %c0_16, %c128] : memref<2x64x256xf32, #tpu.memory_space<vmem>>, vector<2x64x128xf32>
    %c0_17 = arith.constant 0 : index
    %c0_18 = arith.constant 0 : index
    %c0_19 = arith.constant 0 : index
    %11 = vector.load %arg6[%c0_17, %c0_18, %c0_19] : memref<2x64x128xf32, #tpu.memory_space<vmem>>, vector<2x64x128xf32>
    %12 = arith.addf %11, %10 : vector<2x64x128xf32>
    %c0_20 = arith.constant 0 : index
    %c0_21 = arith.constant 0 : index
    %c0_22 = arith.constant 0 : index
    %13 = vector.load %arg6[%c0_20, %c0_21, %c0_22] : memref<2x64x128xf32, #tpu.memory_space<vmem>>, vector<2x64x128xf32>
    tpu.vector_store %arg6[%c0_20, %c0_21, %c0_22], %12 {strides = array<i32>} : memref<2x64x128xf32, #tpu.memory_space<vmem>>, vector<2x64x128xf32>,
    %c0_23 = arith.constant 0 : index
    %c0_24 = arith.constant 0 : index
    %c0_25 = arith.constant 0 : index
    %14 = vector.load %arg7[%c0_23, %c0_24, %c0_25] : memref<2x64x128xf32, #tpu.memory_space<vmem>>, vector<2x64x128xf32>
    %15 = arith.maximumf %14, %10 : vector<2x64x128xf32>
    %c0_26 = arith.constant 0 : index
    %c0_27 = arith.constant 0 : index
    %c0_28 = arith.constant 0 : index
    %16 = vector.load %arg7[%c0_26, %c0_27, %c0_28] : memref<2x64x128xf32, #tpu.memory_space<vmem>>, vector<2x64x128xf32>
    tpu.vector_store %arg7[%c0_26, %c0_27, %c0_28], %15 {strides = array<i32>} : memref<2x64x128xf32, #tpu.memory_space<vmem>>, vector<2x64x128xf32>,
    %c3_i32 = arith.constant 3 : i32
    %17 = arith.cmpi eq, %arg1, %c3_i32 : i32
    %18 = arith.extui %17 : i1 to i32
    %c0_i32_29 = arith.constant 0 : i32
    %19 = arith.cmpi ne, %18, %c0_i32_29 : i32
    scf.if %19 {
      %c0_30 = arith.constant 0 : index
      %c0_31 = arith.constant 0 : index
      %c0_32 = arith.constant 0 : index
      %20 = vector.load %arg6[%c0_30, %c0_31, %c0_32] : memref<2x64x128xf32, #tpu.memory_space<vmem>>, vector<2x64x128xf32>
      %cst = arith.constant dense<0.000000e+00> : vector<2x64xf32>
      %21 = vector.multi_reduction <add>, %20, %cst [2] : vector<2x64x128xf32> to vector<2x64xf32>
      %cst_33 = arith.constant 9.765625E-4 : f32
      %22 = vector.broadcast %cst_33 : f32 to vector<2x64xf32>
      %23 = arith.mulf %21, %22 : vector<2x64xf32>
      %c0_34 = arith.constant 0 : index
      %c0_35 = arith.constant 0 : index
      %c0_36 = arith.constant 0 : index
      %24 = vector.load %arg7[%c0_34, %c0_35, %c0_36] : memref<2x64x128xf32, #tpu.memory_space<vmem>>, vector<2x64x128xf32>
      %cst_37 = arith.constant dense<0xFF800000> : vector<2x64xf32>
      %25 = vector.multi_reduction <maximumf>, %24, %cst_37 [2] : vector<2x64x128xf32> to vector<2x64xf32>
      %c0_38 = arith.constant 0 : index
      %c0_39 = arith.constant 0 : index
      %26 = vector.load %arg3[%c0_38, %c0_39] : memref<64x4xf32, #tpu.memory_space<vmem>>, vector<64x4xf32>
      %c0_40 = arith.constant 0 : index
      %c0_41 = arith.constant 0 : index
      %27 = vector.load %arg4[%c0_40, %c0_41] : memref<4x64xf32, #tpu.memory_space<vmem>>, vector<4x64xf32>
      %cst_42 = arith.constant dense<0.000000e+00> : vector<2x4xf32>
      %28 = tpu.matmul %23, %26, %cst_42 {dimension_numbers = #tpu.dot_dimension_numbers<[1], [0], [0], [1], [0, 0, 1, 1], [], []>} : vector<2x64xf32>, vector<64x4xf32>, vector<2x4xf32> -> vector<2x4xf32>
      %cst_43 = arith.constant 0.000000e+00 : f32
      %29 = vector.broadcast %cst_43 : f32 to vector<2x4xf32>
      %30 = arith.maximumf %28, %29 : vector<2x4xf32>
      %cst_44 = arith.constant dense<0.000000e+00> : vector<2x64xf32>
      %31 = tpu.matmul %30, %27, %cst_44 {dimension_numbers = #tpu.dot_dimension_numbers<[1], [0], [0], [1], [0, 0, 1, 1], [], []>} : vector<2x4xf32>, vector<4x64xf32>, vector<2x64xf32> -> vector<2x64xf32>
      %cst_45 = arith.constant dense<0.000000e+00> : vector<2x4xf32>
      %32 = tpu.matmul %25, %26, %cst_45 {dimension_numbers = #tpu.dot_dimension_numbers<[1], [0], [0], [1], [0, 0, 1, 1], [], []>} : vector<2x64xf32>, vector<64x4xf32>, vector<2x4xf32> -> vector<2x4xf32>
      %cst_46 = arith.constant 0.000000e+00 : f32
      %33 = vector.broadcast %cst_46 : f32 to vector<2x4xf32>
      %34 = arith.maximumf %32, %33 : vector<2x4xf32>
      %cst_47 = arith.constant dense<0.000000e+00> : vector<2x64xf32>
      %35 = tpu.matmul %34, %27, %cst_47 {dimension_numbers = #tpu.dot_dimension_numbers<[1], [0], [0], [1], [0, 0, 1, 1], [], []>} : vector<2x4xf32>, vector<4x64xf32>, vector<2x64xf32> -> vector<2x64xf32>
      %36 = arith.addf %31, %35 : vector<2x64xf32>
      %37 = arith.negf %36 : vector<2x64xf32>
      %38 = math.exp %37 : vector<2x64xf32>
      %cst_48 = arith.constant 1.000000e+00 : f32
      %39 = vector.broadcast %cst_48 : f32 to vector<2x64xf32>
      %40 = arith.addf %39, %38 : vector<2x64xf32>
      %41 = arith.divf %39, %40 : vector<2x64xf32>
      %c0_49 = arith.constant 0 : index
      %c0_50 = arith.constant 0 : index
      %42 = vector.load %arg5[%c0_49, %c0_50] : memref<2x64xf32, #tpu.memory_space<vmem>>, vector<2x64xf32>
      tpu.vector_store %arg5[%c0_49, %c0_50], %41 {strides = array<i32>} : memref<2x64xf32, #tpu.memory_space<vmem>>, vector<2x64xf32>,
    } else {
    }
    return
  }
  func.func @transform_0(%arg0: i32, %arg1: i32) -> (i32, i32, i32) {
    %c0_i32 = arith.constant 0 : i32
    %c0_i32_0 = arith.constant 0 : i32
    return %arg0, %c0_i32, %arg1 : i32, i32, i32
  }
  func.func @transform_1(%arg0: i32, %arg1: i32) -> (i32, i32) {
    %c0_i32 = arith.constant 0 : i32
    %c0_i32_0 = arith.constant 0 : i32
    %c0_i32_1 = arith.constant 0 : i32
    return %c0_i32, %c0_i32_0 : i32, i32
  }
  func.func @transform_2(%arg0: i32, %arg1: i32) -> (i32, i32) {
    %c0_i32 = arith.constant 0 : i32
    %c0_i32_0 = arith.constant 0 : i32
    %c0_i32_1 = arith.constant 0 : i32
    return %c0_i32, %c0_i32_0 : i32, i32
  }
  func.func @transform_3(%arg0: i32, %arg1: i32) -> (i32, i32) {
    %c0_i32 = arith.constant 0 : i32
    %c0_i32_0 = arith.constant 0 : i32
    return %arg0, %c0_i32 : i32, i32
  }
}

</mosaic_0001>

<bundles_post_ra>
// kernel: tpu_custom_call.1
= control target key start
LH: loop header
LB: loop body
LE: loop exit
PB: predicated region body
PF: predicated region fallthrough
CT: control target
= control target key end

     0   :  { %8 = vsyncpa [#allocation5], 0  ;;  %s2005_s0 = inlined_call_operand.hbm [shape: f32[2,64,1024], index: 0, kind: input, shape index: {}]   ;;  %s2006_s1 = inlined_call_operand.vmem [shape: f32[64,4], index: 1, kind: input, shape index: {}]   ;;  %s2007_s2 = inlined_call_operand.vmem [shape: f32[4,64], index: 2, kind: input, shape index: {}]   ;;  %s2008_s3 = inlined_call_operand.hbm [shape: f32[2,64], index: 3, kind: output, shape index: {}]  }
   0x1   :  { %10 = vsyncpa [#allocation5 + $0x1], 0 }
   0x2   :  { %11 = vsyncpa [#allocation6], 0  ;;  %s1505_s12 = smov 0   ;;  %s1507_s13 = smov 0  }
   0x3   :  { %s1509_s14 = smov 0   ;;  %s1511_s15 = smov 0  }
   0x4   :  { %s1513_s16 = smov 0   ;;  %s1515_s17 = smov 0  }
   0x5 LB: > { %s1172_s18 = sadd.s32 4294967295, %s1473_s17   ;;  %s26_s19 = sadd.s32 1, %s1469_s16  ;;  %s1473_s17 = sphi %s1515_s17, %s17_s17   ;;  %s1469_s16 = sphi %s1513_s16, %s2027_s16   ;;  %s1465_s15 = sphi %s1511_s15, %s2026_s15   ;;  %s1461_s14 = sphi %s1509_s14, %s2025_s14   ;;  %s1457_s13 = sphi %s1507_s13, %s2024_s13   ;;  %s1453_s12 = sphi %s1505_s12, %s2023_s12  }
   0x6   : > { %p27_p0 = scmp.ge.s32.totalorder %s26_s19, 4  ;;  %s38_s20 = sadd.s32 1, %s1461_s14 }
   0x7   : > { %p45_p1 = scmp.ne.s32.totalorder %s1461_s14, %s1457_s13  ;;  %p46_p2 = scmp.eq.s32.totalorder %s1473_s17, 0 }
   0x8   : > { %s2029_s19 = smov (%p27_p0, %s26_s19), 0  ;;  %p51_p4 = scmp.ne.s32.totalorder %s1457_s13, %s1453_s12 }
   0x9   : > { %p1541_p3 = por %p46_p2, %p45_p1  ;;  %s34_s22 = ssub.s32 %s1469_s16, %s2029_s19 }
   0xa   : > { %p52_p5 = scmp.eq.s32.totalorder %s1172_s18, 0  ;;  %p36_p6 = scmp.eq.s32.totalorder %s34_s22, 0 }
   0xb   : > { %p1299_p8 = scmp.lt.s32.totalorder %s1473_s17, 4  ;;  %s149_s25 = sand.u32 1, %s1461_s14  }
   0xc   : > { %p1550_p7 = por %p52_p5, %p51_p4  ;;  %s1193_s26 = sshll.u32 %s1469_s16, 8 }
   0xd   : > { %s1556_s24 = scalar_select %p36_p6, %s1461_s14, %s38_s20  }
   0xe   : > { %s1175_s27 = sshll.u32 %s149_s25, 8  ;;  %s1563_s30 = scalar_lea.hbm %s2005_s0, %s1193_s26 }
   0xf   : > { %s153_s4 = scalar_lea.vmem [#allocation4], %s1175_s27  ;;  %p1567_p9 = pnand %p1299_p8, %p1541_p3 }
  0x10   : > { %s163_s5 = sshll.u32 %s153_s4, 4  ;;  %s1574_s7 = scalar_lea.sflag [#allocation5], %s149_s25  ;;  %s1571_s5 = int_to_ptr.vmem [resolvable:$true] %s163_s5 }
  0x11   : > { %s1363_s8 = scalar_lea.hbm %s1563_s30, 4096  ;;  %p1365_p12 = pneg %p1567_p9 }
  0x12   : > { %p1364_p11 = scmp.ne.s32.totalorder %s1563_s30, %s1363_s8  ;;  %s1368_s11 = scalar_lea.hbm %s2005_s0, 16384 }
  0x13   : > { %p1369_p1 = scmp.lt.u32.totalorder %s1563_s30, %s2005_s0  ;;  %p1370_p2 = scmp.lt.u32.totalorder %s1368_s11, %s1363_s8 }
  0x14   : > { %p1366_p13 = pnand %p1365_p12, %p1364_p11  ;;  %p1372_p4 = scmp.lt.u32.totalorder %s1363_s8, %s1563_s30 }
  0x15   : > { %p1371_p3 = por %p1370_p2, %p1369_p1 }
  0x16   : > { %p1367_p0 = pneg %p1366_p13 }
  0x17   : > { %p1373_p5 = por %p1372_p4, %p1371_p3 }
  0x19   : > { %p1374_p6 = pnand %p1373_p5, %p1367_p0 }
  0x1b   : > { %1377 = shalt.err (!%p1374_p6)
}
  0x1c   : > { %s1378_s21 = scalar_lea.vmem %s1571_s5, 4096  ;;  %s1475_s22 = smov [#allocation4]  }
  0x1d   : > { %p1379_p8 = scmp.ne.s32.totalorder %s1571_s5, %s1378_s21  ;;  %s1383_s25 = sshll.u32 %s1475_s22, 4  ;;  %s1384_s25 = int_to_ptr.vmem [resolvable:$false] %s1383_s25 }
  0x1e   : > { %s1385_s26 = scalar_lea.vmem %s1384_s25, 8192  ;;  %p1386_p10 = scmp.lt.s32.totalorder %s1571_s5, %s1384_s25 }
  0x1f   : > { %p1381_p11 = pnand %p1379_p8, %p1365_p12  ;;  %p1387_p1 = scmp.lt.s32.totalorder %s1385_s26, %s1378_s21 }
  0x21   : > { %p1382_p13 = pneg %p1381_p11  ;;  %p1388_p2 = por %p1387_p1, %p1386_p10 }
  0x23   : > { %p1389_p3 = pnand %p1388_p2, %p1382_p13 }
  0x25   : > { %1392 = shalt.err (!%p1389_p3)
}
  0x26   : > { %s1476_s27 = smov 1024   ;;  %s1477_s28 = smov 256  }
  0x27   : > { %s1478_s29 = smov 16   ;;  %p171_p12 = scmp.lt.s32.totalorder %s1473_s17, 5 }
  0x28   : > { %1298 = dma.hbm_to_vmem [thread:$0]  (!%p1567_p9), %s1563_s30, 4096, %s1571_s5, %s1574_s7, %s1476_s27, %s1477_s28, %s1478_s29  }
  0x29   : > { %p2012_p0 = scmp.ge.s32.totalorder %s1473_s17, 1 }
  0x2b   : > { %p172_p4 = pnand %p2012_p0, %p171_p12 }
  0x2c   : > { %s177_s4 = sand.u32 (!%p172_p4), 1, %s1457_s13  }
  0x2d   : > { %175 = sbr.rel (%p172_p4) target bundleno = 789 (0x315), region = 32  ;;  %s1179_s8 = sshll.u32 (!%p172_p4), %s177_s4, 8 }
  0x2e   : > { %s178_s9 = scalar_lea.sflag (!%p172_p4), [#allocation5], %s177_s4  ;;  %s1606_s10 = scalar_lea.vmem (!%p172_p4), [#allocation4], %s1179_s8 }
  0x34   : > { %1444 = dma.done.wait (%p1550_p7), %s178_s9, 4096  }
  0x35   : > { %1446 = vsyncadd (%p1550_p7), %s178_s9, 4294963200  ;;  %p1180_p10 = scmp.ne.s32.totalorder %s1465_s15, 0 }
  0x36   : > { %v1479_v0 = vmov (!%p1180_p10), 0.0   ;;  %v1480_v1 = vmov (!%p1180_p10), -inf  }
  0x37   : > { %204 = sbr.rel (%p1180_p10) target bundleno = 71 (0x47), region = 40  ;;  %205 = vst [vmem:[#allocation2] sm:$0xff] (!%p1180_p10), %v1479_v0  ;;  %206 = vst [vmem:[#allocation2 + $0x8] sm:$0xff] (!%p1180_p10), %v1479_v0 }
  0x38   : > { %207 = vst [vmem:[#allocation2 + $0x10] sm:$0xff] (!%p1180_p10), %v1479_v0  ;;  %208 = vst [vmem:[#allocation2 + $0x18] sm:$0xff] (!%p1180_p10), %v1479_v0 }
  0x39   : > { %209 = vst [vmem:[#allocation2 + $0x20] sm:$0xff] (!%p1180_p10), %v1479_v0  ;;  %210 = vst [vmem:[#allocation2 + $0x28] sm:$0xff] (!%p1180_p10), %v1479_v0 }
  0x3a   : > { %211 = vst [vmem:[#allocation2 + $0x30] sm:$0xff] (!%p1180_p10), %v1479_v0  ;;  %212 = vst [vmem:[#allocation2 + $0x38] sm:$0xff] (!%p1180_p10), %v1479_v0 }
  0x3b   : > { %213 = vst [vmem:[#allocation2 + $0x40] sm:$0xff] (!%p1180_p10), %v1479_v0  ;;  %214 = vst [vmem:[#allocation2 + $0x48] sm:$0xff] (!%p1180_p10), %v1479_v0 }
  0x3c   : > { %215 = vst [vmem:[#allocation2 + $0x50] sm:$0xff] (!%p1180_p10), %v1479_v0  ;;  %216 = vst [vmem:[#allocation2 + $0x58] sm:$0xff] (!%p1180_p10), %v1479_v0 }
  0x3d   : > { %217 = vst [vmem:[#allocation2 + $0x60] sm:$0xff] (!%p1180_p10), %v1479_v0  ;;  %218 = vst [vmem:[#allocation2 + $0x68] sm:$0xff] (!%p1180_p10), %v1479_v0 }
  0x3e   : > { %219 = vst [vmem:[#allocation2 + $0x70] sm:$0xff] %v1479_v0  ;;  %220 = vst [vmem:[#allocation2 + $0x78] sm:$0xff] %v1479_v0 }
  0x3f   : > { %221 = vst [vmem:[#allocation3] sm:$0xff] %v1480_v1  ;;  %222 = vst [vmem:[#allocation3 + $0x8] sm:$0xff] %v1480_v1 }
  0x40   : > { %223 = vst [vmem:[#allocation3 + $0x10] sm:$0xff] %v1480_v1  ;;  %224 = vst [vmem:[#allocation3 + $0x18] sm:$0xff] %v1480_v1 }
  0x41   : > { %225 = vst [vmem:[#allocation3 + $0x20] sm:$0xff] %v1480_v1  ;;  %226 = vst [vmem:[#allocation3 + $0x28] sm:$0xff] %v1480_v1 }
  0x42   : > { %227 = vst [vmem:[#allocation3 + $0x30] sm:$0xff] %v1480_v1  ;;  %228 = vst [vmem:[#allocation3 + $0x38] sm:$0xff] %v1480_v1 }
  0x43   : > { %229 = vst [vmem:[#allocation3 + $0x40] sm:$0xff] %v1480_v1  ;;  %230 = vst [vmem:[#allocation3 + $0x48] sm:$0xff] %v1480_v1 }
  0x44   : > { %231 = vst [vmem:[#allocation3 + $0x50] sm:$0xff] %v1480_v1  ;;  %232 = vst [vmem:[#allocation3 + $0x58] sm:$0xff] %v1480_v1 }
  0x45   : > { %233 = vst [vmem:[#allocation3 + $0x60] sm:$0xff] %v1480_v1  ;;  %234 = vst [vmem:[#allocation3 + $0x68] sm:$0xff] %v1480_v1 }
  0x46   : > { %235 = vst [vmem:[#allocation3 + $0x70] sm:$0xff] %v1480_v1  ;;  %236 = vst [vmem:[#allocation3 + $0x78] sm:$0xff] %v1480_v1 }
  0x47 PF: > { %v1614_v2 = vld [vmem:[%s1606_s10] sm:$0xff]  ;;  %v1617_v4 = vld [vmem:[%s1606_s10 + $0x10] sm:$0xff]  ;;  %v254_v5 = vld [vmem:[#allocation2 + $0x8] sm:$0xff]  ;;  %p1181_p7 = scmp.ne.s32.totalorder %s1465_s15, 3 }
  0x48   : > { %v253_v3 = vld [vmem:[#allocation2] sm:$0xff]  ;;  %v255_v7 = vld [vmem:[#allocation2 + $0x10] sm:$0xff]  ;;  %v256_v9 = vld [vmem:[#allocation2 + $0x18] sm:$0xff]  ;;  %v270_v30 = vadd.f32 %v254_v5, %v1617_v4  ;;  %vm1482_vm0 = vmmov (!%p1181_p7), 0   ;;  %vm613_vm1 = vcmask (!%p1181_p7), 130112   ;;  %vm620_vm2 = vcmask (!%p1181_p7), 195712  }
  0x49   : > { %v1620_v6 = vld [vmem:[%s1606_s10 + $0x20] sm:$0xff]  ;;  %v1623_v8 = vld [vmem:[%s1606_s10 + $0x30] sm:$0xff]  ;;  %v258_v13 = vld [vmem:[#allocation2 + $0x28] sm:$0xff]  ;;  %v269_v29 = vadd.f32 %v253_v3, %v1614_v2  ;;  %vm627_vm3 = vcmask (!%p1181_p7), 261312   ;;  %vm634_vm4 = vcmask (!%p1181_p7), 326912   ;;  %vm641_vm5 = vcmask (!%p1181_p7), 392512  }
  0x4a   : > { %v1626_v10 = vld [vmem:[%s1606_s10 + $0x40] sm:$0xff]  ;;  %v1629_v12 = vld [vmem:[%s1606_s10 + $0x50] sm:$0xff]  ;;  %v260_v17 = vld [vmem:[#allocation2 + $0x38] sm:$0xff]  ;;  %v271_v31 = vadd.f32 %v255_v7, %v1620_v6  ;;  %v272_v32 = vadd.f32 %v256_v9, %v1623_v8  ;;  %vm648_vm6 = vcmask (!%p1181_p7), 458112   ;;  %vm655_vm7 = vcmask (!%p1181_p7), 523712  }
  0x4b   : > { %v257_v11 = vld [vmem:[#allocation2 + $0x20] sm:$0xff]  ;;  %v259_v15 = vld [vmem:[#allocation2 + $0x30] sm:$0xff]  ;;  %v262_v21 = vld [vmem:[#allocation2 + $0x48] sm:$0xff]  ;;  %v274_v37 = vadd.f32 %v258_v13, %v1629_v12  ;;  %vm696_vm8 = vcmask (!%p1181_p7), 1041409   ;;  %vm698_vm9 = vcmask (!%p1181_p7), 523264   ;;  %vm944_vm10 = vcmask (!%p1181_p7), 1043456  }
  0x4c   : > { %v1632_v14 = vld [vmem:[%s1606_s10 + $0x60] sm:$0xff]  ;;  %v1635_v16 = vld [vmem:[%s1606_s10 + $0x70] sm:$0xff]  ;;  %v264_v25 = vld [vmem:[#allocation2 + $0x58] sm:$0xff]  ;;  %v273_v36 = vadd.f32 %v257_v11, %v1626_v10  ;;  %vm940_vm11 = vcmask (!%p1181_p7), 31744   ;;  %vm1097_vm12 = vcmask (!%p1181_p7), 517120  }
  0x4d   : > { %v1638_v18 = vld [vmem:[%s1606_s10 + $0x80] sm:$0xff]  ;;  %v1641_v20 = vld [vmem:[%s1606_s10 + $0x90] sm:$0xff]  ;;  %v266_v33 = vld [vmem:[#allocation2 + $0x68] sm:$0xff]  ;;  %v1665_v38 = vadd.f32 %v259_v15, %v1632_v14  ;;  %v1668_v39 = vadd.f32 %v260_v17, %v1635_v16 }
  0x4e   : > { %v261_v19 = vld [vmem:[#allocation2 + $0x40] sm:$0xff]  ;;  %v263_v23 = vld [vmem:[#allocation2 + $0x50] sm:$0xff]  ;;  %v268_v41 = vld [vmem:[#allocation2 + $0x78] sm:$0xff]  ;;  %v1675_v44 = vadd.f32 %v262_v21, %v1641_v20 }
  0x4f   : > { %v1644_v22 = vld [vmem:[%s1606_s10 + $0xa0] sm:$0xff]  ;;  %v1647_v24 = vld [vmem:[%s1606_s10 + $0xb0] sm:$0xff]  ;;  %v277_v43 = vadd.f32 %v261_v19, %v1638_v18  ;;  %v302_v47 = vld [vmem:[#allocation3 + $0x8] sm:$0xff] }
  0x50   : > { %v1650_v26 = vld [vmem:[%s1606_s10 + $0xc0] sm:$0xff]  ;;  %v1653_v28 = vld [vmem:[%s1606_s10 + $0xd0] sm:$0xff]  ;;  %v1678_v45 = vadd.f32 %v263_v23, %v1644_v22  ;;  %v1681_v46 = vadd.f32 %v264_v25, %v1647_v24  ;;  %v1683_v49 = vld [vmem:[#allocation3 + $0x18] sm:$0xff]  ;;  %v318_v58 = vmax.f32 %v302_v47, %v1617_v4 }
  0x51   : > { %v265_v27 = vld [vmem:[#allocation2 + $0x60] sm:$0xff]  ;;  %v267_v35 = vld [vmem:[#allocation2 + $0x70] sm:$0xff]  ;;  %v1689_v51 = vadd.f32 %v266_v33, %v1653_v28  ;;  %v1699_v55 = vld [vmem:[#allocation3 + $0x28] sm:$0xff]  ;;  %v320_v60 = vmax.f32 %v1683_v49, %v1623_v8 }
  0x52   : > { %v1660_v34 = vld [vmem:[%s1606_s10 + $0xe0] sm:$0xff]  ;;  %v1671_v40 = vld [vmem:[%s1606_s10 + $0xf0] sm:$0xff]  ;;  %v1686_v50 = vadd.f32 %v265_v27, %v1650_v26  ;;  %v1708_v61 = vld [vmem:[#allocation3 + $0x38] sm:$0xff]  ;;  %v322_v1 = vmax.f32 %v1699_v55, %v1629_v12 }
  0x53   : > { %v301_v42 = vld [vmem:[#allocation3] sm:$0xff]  ;;  %v303_v48 = vld [vmem:[#allocation3 + $0x10] sm:$0xff]  ;;  %v1692_v52 = vadd.f32 %v267_v35, %v1660_v34  ;;  %v1695_v53 = vadd.f32 %v268_v41, %v1671_v40  ;;  %v1712_v63 = vld [vmem:[#allocation3 + $0x48] sm:$0xff] }
  0x54   : > { %v1697_v54 = vld [vmem:[#allocation3 + $0x20] sm:$0xff]  ;;  %v1701_v56 = vld [vmem:[#allocation3 + $0x30] sm:$0xff]  ;;  %v317_v57 = vmax.f32 %v301_v42, %v1614_v2  ;;  %v319_v59 = vmax.f32 %v303_v48, %v1620_v6  ;;  %v1724_v5 = vld [vmem:[#allocation3 + $0x58] sm:$0xff]  ;;  %v2015_v12 = vmax.f32 %v1712_v63, %v1641_v20 }
  0x55   : > { %v1710_v62 = vld [vmem:[#allocation3 + $0x40] sm:$0xff]  ;;  %v321_v0 = vmax.f32 %v1697_v54, %v1626_v10  ;;  %v323_v2 = vmax.f32 %v1701_v56, %v1632_v14  ;;  %v1722_v4 = vld [vmem:[#allocation3 + $0x50] sm:$0xff]  ;;  %v1736_v13 = vld [vmem:[#allocation3 + $0x68] sm:$0xff] }
  0x56   : > { %v1726_v6 = vld [vmem:[#allocation3 + $0x60] sm:$0xff]  ;;  %v1738_v15 = vld [vmem:[#allocation3 + $0x70] sm:$0xff]  ;;  %v1740_v17 = vld [vmem:[#allocation3 + $0x78] sm:$0xff]  ;;  %v2014_v10 = vmax.f32 %v1710_v62, %v1638_v18  ;;  %v2016_v14 = vmax.f32 %v1722_v4, %v1644_v22  ;;  %v2019_v20 = vmax.f32 %v1736_v13, %v1653_v28 }
  0x57   : > { %v349_v27 = vld [vmem:[%s1606_s10 + $0x8] sm:$0xff]  ;;  %v350_v33 = vld [vmem:[%s1606_s10 + $0x18] sm:$0xff]  ;;  %v2018_v18 = vmax.f32 %v1726_v6, %v1650_v26  ;;  %v2020_v22 = vmax.f32 %v1738_v15, %v1660_v34 }
  0x58   : > { %v351_v35 = vld [vmem:[%s1606_s10 + $0x28] sm:$0xff]  ;;  %v381_v41 = vadd.f32 %v349_v27, %v269_v29  ;;  %v382_v42 = vadd.f32 %v350_v33, %v270_v30  ;;  %v352_v48 = vld [vmem:[%s1606_s10 + $0x38] sm:$0xff]  ;;  %v429_v21 = vmax.f32 %v317_v57, %v349_v27  ;;  %v430_v3 = vmax.f32 %v318_v58, %v350_v33 }
  0x59   : > { %v383_v47 = vadd.f32 %v351_v35, %v271_v31  ;;  %v353_v49 = vld [vmem:[%s1606_s10 + $0x48] sm:$0xff]  ;;  %v354_v19 = vld [vmem:[%s1606_s10 + $0x58] sm:$0xff]  ;;  %v384_v11 = vadd.f32 %v352_v48, %v272_v32 }
  0x5a   : > { %v385_v23 = vadd.f32 %v353_v49, %v273_v36  ;;  %v386_v9 = vadd.f32 %v354_v19, %v274_v37  ;;  %v355_v8 = vld [vmem:[%s1606_s10 + $0x68] sm:$0xff]  ;;  %v356_v7 = vld [vmem:[%s1606_s10 + $0x78] sm:$0xff]  ;;  %397 = vst [vmem:[#allocation2] sm:$0xff] %v381_v41  ;;  %398 = vst [vmem:[#allocation2 + $0x8] sm:$0xff] %v382_v42  ;;  %v431_v36 = vmax.f32 %v319_v59, %v351_v35 }
  0x5b   : > { %v357_v25 = vld [vmem:[%s1606_s10 + $0x88] sm:$0xff]  ;;  %399 = vst [vmem:[#allocation2 + $0x10] sm:$0xff] %v383_v47  ;;  %v387_v29 = vadd.f32 %v355_v8, %v1665_v38  ;;  %v388_v30 = vadd.f32 %v356_v7, %v1668_v39  ;;  %v358_v57 = vld [vmem:[%s1606_s10 + $0x98] sm:$0xff]  ;;  %445 = vst [vmem:[#allocation3] sm:$0xff] %v429_v21  ;;  %v432_v39 = vmax.f32 %v320_v60, %v352_v48 }
  0x5c   : > { %v389_v31 = vadd.f32 %v357_v25, %v277_v43  ;;  %v359_v27 = vld [vmem:[%s1606_s10 + $0xa8] sm:$0xff]  ;;  %v360_v32 = vld [vmem:[%s1606_s10 + $0xb8] sm:$0xff]  ;;  %400 = vst [vmem:[#allocation2 + $0x18] sm:$0xff] %v384_v11  ;;  %401 = vst [vmem:[#allocation2 + $0x20] sm:$0xff] %v385_v23  ;;  %v390_v37 = vadd.f32 %v358_v57, %v1675_v44  ;;  %v433_v44 = vmax.f32 %v321_v0, %v353_v49 }
  0x5d   : > { %402 = vst [vmem:[#allocation2 + $0x28] sm:$0xff] %v386_v9  ;;  %v391_v58 = vadd.f32 %v359_v27, %v1678_v45  ;;  %v392_v33 = vadd.f32 %v360_v32, %v1681_v46  ;;  %v361_v38 = vld [vmem:[%s1606_s10 + $0xc8] sm:$0xff]  ;;  %v362_v41 = vld [vmem:[%s1606_s10 + $0xd8] sm:$0xff]  ;;  %446 = vst [vmem:[#allocation3 + $0x8] sm:$0xff] %v430_v3  ;;  %v434_v46 = vmax.f32 %v322_v1, %v354_v19 }
  0x5e   : > { %v363_v42 = vld [vmem:[%s1606_s10 + $0xe8] sm:$0xff]  ;;  %403 = vst [vmem:[#allocation2 + $0x30] sm:$0xff] %v387_v29  ;;  %404 = vst [vmem:[#allocation2 + $0x38] sm:$0xff] %v388_v30  ;;  %v393_v43 = vadd.f32 %v361_v38, %v1686_v50  ;;  %v394_v59 = vadd.f32 %v362_v41, %v1689_v51  ;;  %v364_v11 = vld [vmem:[%s1606_s10 + $0xf8] sm:$0xff]  ;;  %v435_v50 = vmax.f32 %v323_v2, %v355_v8 }
  0x5f   : > { %405 = vst [vmem:[#allocation2 + $0x40] sm:$0xff] %v389_v31  ;;  %v395_v9 = vadd.f32 %v363_v42, %v1692_v52  ;;  %447 = vst [vmem:[#allocation3 + $0x10] sm:$0xff] %v431_v36  ;;  %v396_v45 = vadd.f32 %v364_v11, %v1695_v53  ;;  %v2013_v51 = vmax.f32 %v1708_v61, %v1635_v16 }
  0x60   : > { %406 = vst [vmem:[#allocation2 + $0x48] sm:$0xff] %v390_v37  ;;  %407 = vst [vmem:[#allocation2 + $0x50] sm:$0xff] %v391_v58  ;;  %v437_v53 = vmax.f32 %v2014_v10, %v357_v25  ;;  %v438_v54 = vmax.f32 %v2015_v12, %v358_v57  ;;  %v439_v55 = vmax.f32 %v2016_v14, %v359_v27  ;;  %v577_v27 = vld [vmem:[%s2006_s1] sm:$0xff] (!%p1181_p7) }
  0x61   : > { %408 = vst [vmem:[#allocation2 + $0x58] sm:$0xff] %v392_v33  ;;  %448 = vst [vmem:[#allocation3 + $0x18] sm:$0xff] %v432_v39  ;;  %v436_v52 = vmax.f32 %v2013_v51, %v356_v7  ;;  %v2017_v16 = vmax.f32 %v1724_v5, %v1647_v24  ;;  %v441_v60 = vmax.f32 %v2018_v18, %v361_v38  ;;  %v465_v28 = vld [vmem:[#allocation2] sm:$0xff] (!%p1181_p7)  ;;  %v466_v0 = vld [vmem:[#allocation2 + $0x8] sm:$0xff] (!%p1181_p7)  ;;  %v1481_v33 = vmov (!%p1181_p7), 0.0|0.0  }
  0x62   : > { %409 = vst [vmem:[#allocation2 + $0x60] sm:$0xff] %v393_v43  ;;  %410 = vst [vmem:[#allocation2 + $0x68] sm:$0xff] %v394_v59  ;;  %v442_v61 = vmax.f32 %v2019_v20, %v362_v41  ;;  %v443_v62 = vmax.f32 %v2020_v22, %v363_v42  ;;  %v2021_v24 = vmax.f32 %v1740_v17, %v1671_v40  ;;  %481 = vadd.xlane.f32.xlu0 (!%p1181_p7), %v465_v28  ;;  %v467_v1 = vld [vmem:[#allocation2 + $0x10] sm:$0xff] (!%p1181_p7)  ;;  %v529_v5 = vld [vmem:[#allocation3] sm:$0xff] (!%p1181_p7)  ;;  %v602_v22 = vlaneseq (!%p1181_p7) }
  0x63   : > { %411 = vst [vmem:[#allocation2 + $0x70] sm:$0xff] %v395_v9  ;;  %449 = vst [vmem:[#allocation3 + $0x20] sm:$0xff] %v433_v44  ;;  %v440_v56 = vmax.f32 %v2017_v16, %v360_v32  ;;  %464 = sbr.rel (%p1181_p7) target bundleno = 764 (0x2fc), region = 44  ;;  %v468_v3 = vld [vmem:[#allocation2 + $0x18] sm:$0xff] (!%p1181_p7)  ;;  %v469_v13 = vld [vmem:[#allocation2 + $0x20] sm:$0xff] (!%p1181_p7)  ;;  %1264 = vmatprep.subr.bf16.mxu0 (!%p1181_p7), %v1481_v33  ;;  %1276 = vmatprep.subr.bf16.mxu1 (!%p1181_p7), %v1481_v33 }
  0x64   : > { %412 = vst [vmem:[#allocation2 + $0x78] sm:$0xff] %v396_v45  ;;  %450 = vst [vmem:[#allocation3 + $0x28] sm:$0xff] %v434_v46  ;;  %v444_v63 = vmax.f32 %v2021_v24, %v364_v11  ;;  %v530_v4 = vld [vmem:[#allocation3 + $0x8] sm:$0xff] (!%p1181_p7)  ;;  %v579_v38 = vld [vmem:[%s2006_s1 + $0x10] sm:$0xff] (!%p1181_p7) }
  0x65   : > { %451 = vst [vmem:[#allocation3 + $0x30] sm:$0xff] %v435_v50  ;;  %452 = vst [vmem:[#allocation3 + $0x38] sm:$0xff] %v436_v52  ;;  %v470_v21 = vld [vmem:[#allocation2 + $0x28] sm:$0xff] (!%p1181_p7)  ;;  %v471_v47 = vld [vmem:[#allocation2 + $0x30] sm:$0xff] (!%p1181_p7)  ;;  %v1483_v50 = vmov (!%p1181_p7), 0.0  }
  0x66   : > { %453 = vst [vmem:[#allocation3 + $0x40] sm:$0xff] %v437_v53  ;;  %454 = vst [vmem:[#allocation3 + $0x48] sm:$0xff] %v438_v54  ;;  %v473_v26 = vld [vmem:[#allocation2 + $0x40] sm:$0xff] (!%p1181_p7)  ;;  %483 = vadd.xlane.f32.xlu0 (!%p1181_p7), %v466_v0  ;;  %v531_v17 = vld [vmem:[#allocation3 + $0x10] sm:$0xff] (!%p1181_p7)  ;;  %1232 = vmatprep.mubr.msk.f32.mxu0 (!%p1181_p7), %vm1482_vm0, %v1483_v50 }
  0x67   : > { %455 = vst [vmem:[#allocation3 + $0x50] sm:$0xff] %v439_v55  ;;  %456 = vst [vmem:[#allocation3 + $0x58] sm:$0xff] %v440_v56  ;;  %497 = vadd.xlane.f32.xlu1 (!%p1181_p7), %v473_v26  ;;  %v474_v34 = vld [vmem:[#allocation2 + $0x48] sm:$0xff] (!%p1181_p7)  ;;  %v475_v40 = vld [vmem:[#allocation2 + $0x50] sm:$0xff] (!%p1181_p7)  ;;  %1251 = vmatprep.mubr.msk.f32.mxu1 (!%p1181_p7), %vm1482_vm0, %v1483_v50 }
  0x68   : > { %457 = vst [vmem:[#allocation3 + $0x60] sm:$0xff] %v441_v60  ;;  %458 = vst [vmem:[#allocation3 + $0x68] sm:$0xff] %v442_v61  ;;  %v476_v2 = vld [vmem:[#allocation2 + $0x58] sm:$0xff] (!%p1181_p7)  ;;  %v578_v32 = vld [vmem:[%s2006_s1 + $0x8] sm:$0xff] (!%p1181_p7) }
  0x69   : > { %459 = vst [vmem:[#allocation3 + $0x70] sm:$0xff] %v443_v62  ;;  %460 = vst [vmem:[#allocation3 + $0x78] sm:$0xff] %v444_v63  ;;  %v477_v8 = vld [vmem:[#allocation2 + $0x60] sm:$0xff] (!%p1181_p7)  ;;  %v478_v19 = vld [vmem:[#allocation2 + $0x68] sm:$0xff] (!%p1181_p7)  ;;  %v1265_v36 = vpack.c.bf16 (!%p1181_p7), %v578_v32, %v577_v27  ;;  %v603_v63 = vand.u32 (!%p1181_p7), 127, %v602_v22 }
  0x6a   : > { %485 = vadd.xlane.f32.xlu0 %v467_v1  ;;  %v532_v25 = vld [vmem:[#allocation3 + $0x18] sm:$0xff]  ;;  %v479_v35 = vld [vmem:[#allocation2 + $0x70] sm:$0xff]  ;;  %v533_v49 = vld [vmem:[#allocation3 + $0x20] sm:$0xff] }
  0x6b   : > { %499 = vadd.xlane.f32.xlu1 %v474_v34  ;;  %v480_v29 = vld [vmem:[#allocation2 + $0x78] sm:$0xff]  ;;  %v534_v57 = vld [vmem:[#allocation3 + $0x28] sm:$0xff]  ;;  %1266 = vmatpush3.bf16.msra.mxu0 %v1265_v36  ;;  %v581_v59 = vld [vmem:[%s2006_s1 + $0x20] sm:$0xff]  ;;  %v605_v34 = vshrl.u32 %v602_v22, 7  ;;  %v608_v0 = vadd.s32 4294967288, %v603_v63  ;;  %v622_v1 = vadd.s32 4294967272, %v603_v63 }
  0x6c   : > { %v472_v30 = vld [vmem:[#allocation2 + $0x38] sm:$0xff]  ;;  %v535_v58 = vld [vmem:[#allocation3 + $0x30] sm:$0xff]  ;;  %1278 = vmatpush3.bf16.msra.mxu1 %v1265_v36  ;;  %1267 = vmatprep.subr.bf16.mxu0 %v1481_v33  ;;  %v582_v9 = vld [vmem:[%s2006_s1 + $0x28] sm:$0xff]  ;;  %v650_v36 = vadd.s32 4294967240, %v603_v63 }
  0x6d   : > { %v538_v6 = vld [vmem:[#allocation3 + $0x48] sm:$0xff]  ;;  %v537_v7 = vld [vmem:[#allocation3 + $0x40] sm:$0xff]  ;;  %v580_v41 = vld [vmem:[%s2006_s1 + $0x18] sm:$0xff]  ;;  %1279 = vmatprep.subr.bf16.mxu1 %v1481_v33  ;;  %v1271_v11 = vpack.c.bf16 %v582_v9, %v581_v59 }
  0x6e   : > { %487 = vadd.xlane.f32.xlu0 %v468_v3  ;;  %v539_v15 = vld [vmem:[#allocation3 + $0x50] sm:$0xff]  ;;  %v540_v23 = vld [vmem:[#allocation3 + $0x58] sm:$0xff]  ;;  %v1268_v42 = vpack.c.bf16 %v580_v41, %v579_v38  ;;  %v636_v3 = vadd.s32 4294967256, %v603_v63 }
  0x6f   : > { %501 = vadd.xlane.f32.xlu1 %v475_v40  ;;  %v541_v48 = vld [vmem:[#allocation3 + $0x60] sm:$0xff]  ;;  %v542_v31 = vld [vmem:[#allocation3 + $0x68] sm:$0xff]  ;;  %v536_v43 = vld [vmem:[#allocation3 + $0x38] sm:$0xff]  ;;  %v615_v40 = vadd.s32 4294967280, %v603_v63 }
  0x70   : > { %v543_v37 = vld [vmem:[#allocation3 + $0x70] sm:$0xff]  ;;  %v544_v39 = vld [vmem:[#allocation3 + $0x78] sm:$0xff]  ;;  %1269 = vmatpush3.bf16.msra.mxu0 %v1268_v42  ;;  %1281 = vmatpush3.bf16.msra.mxu1 %v1268_v42 }
  0x71   : > { %1270 = vmatprep.subr.bf16.mxu0 %v1481_v33  ;;  %1282 = vmatprep.subr.bf16.mxu1 %v1481_v33  ;;  %v583_v44 = vld [vmem:[%s2006_s1 + $0x30] sm:$0xff]  ;;  %v584_v45 = vld [vmem:[%s2006_s1 + $0x38] sm:$0xff] }
  0x72   : > { %545 = vmax.xlane.f32.xlu0 %v529_v5  ;;  %v1274_v46 = vpack.c.bf16 %v584_v45, %v583_v44 }
  0x73   : > { %503 = vadd.xlane.f32.xlu1 %v476_v2  ;;  %v629_v2 = vadd.s32 4294967264, %v603_v63 }
  0x74   : > { %1272 = vmatpush3.bf16.msra.mxu0 %v1271_v11  ;;  %1284 = vmatpush3.bf16.msra.mxu1 %v1271_v11 }
  0x75   : > { %1273 = vmatprep.subr.bf16.mxu0 %v1481_v33  ;;  %1285 = vmatprep.subr.bf16.mxu1 %v1481_v33 }
  0x76   : > { %561 = vmax.xlane.f32.xlu0 %v537_v7  ;;  %v1860_v7 = vsub.s32 %v608_v0, %v605_v34 }
  0x77   : > { %547 = vmax.xlane.f32.xlu1 %v530_v4 }
  0x78   : > { %1275 = vmatpush3.bf16.msra.mxu0 %v1274_v46  ;;  %1287 = vmatpush3.bf16.msra.mxu1 %v1274_v46 }
  0x79   : > { %1259 = vmatprep.subr.mxu0 %v1483_v50  ;;  %1254 = vmatprep.subr.mxu1 %v1483_v50 }
  0x7a   : > { %489 = vadd.xlane.f32.xlu0 %v469_v13  ;;  %v1864_v13 = vsub.s32 %v622_v1, %v605_v34 }
  0x7b   : > { %563 = vmax.xlane.f32.xlu1 %v538_v6  ;;  %v1858_v6 = vsub.s32 %v603_v63, %v605_v34 }
  0x7e   : > { %549 = vmax.xlane.f32.xlu0 %v531_v17 }
  0x7f   : > { %505 = vadd.xlane.f32.xlu1 %v477_v8  ;;  %v1862_v8 = vsub.s32 %v615_v40, %v605_v34 }
  0x82   : > { %491 = vadd.xlane.f32.xlu0 %v470_v21  ;;  %v1866_v21 = vsub.s32 %v629_v2, %v605_v34 }
  0x83   : > { %565 = vmax.xlane.f32.xlu1 %v539_v15  ;;  %v643_v15 = vadd.s32 4294967248, %v603_v63 }
  0x85   : > { %v1870_v32 = vsub.s32 %v643_v15, %v605_v34 }
  0x86   : > { %551 = vmax.xlane.f32.xlu0 %v532_v25 }
  0x87   : > { %507 = vadd.xlane.f32.xlu1 %v478_v19 }
  0x8a   : > { %493 = vadd.xlane.f32.xlu0 %v471_v47 }
  0x8b   : > { %567 = vmax.xlane.f32.xlu1 %v540_v23 }
  0x8e   : > { %553 = vmax.xlane.f32.xlu0 %v533_v49 }
  0x8f   : > { %509 = vadd.xlane.f32.xlu1 %v479_v35  ;;  %v1868_v35 = vsub.s32 %v636_v3, %v605_v34 }
  0x92   : > { %495 = vadd.xlane.f32.xlu0 %v472_v30 }
  0x93   : > { %569 = vmax.xlane.f32.xlu1 %v541_v48 }
  0x96   : > { %555 = vmax.xlane.f32.xlu0 %v534_v57 }
  0x97   : > { %511 = vadd.xlane.f32.xlu1 %v480_v29 }
  0x9a   : > { %557 = vmax.xlane.f32.xlu0 %v535_v58 }
  0x9b   : > { %571 = vmax.xlane.f32.xlu1 %v542_v31 }
  0x9e   : > { %559 = vmax.xlane.f32.xlu0 %v536_v43 }
  0x9f   : > { %573 = vmax.xlane.f32.xlu1 %v543_v37 }
  0xa3   : > { %575 = vmax.xlane.f32.xlu1 %v544_v39 }
  0xef   : > { %v482_v52 = vpop.xlane.xlu0 %481 }
  0xf0   : > { %v513_v29 = vmul.f32 0.0009765625, %v482_v52 }
  0xf2   : > { %v607_v44 = vrot.slane %v513_v29, %v1858_v6 }
  0xf3   : > { %v484_v53 = vpop.xlane.xlu0 %483 }
  0xf4   : > { %v498_v51 = vpop.xlane.xlu1 %497  ;;  %v514_v19 = vmul.f32 0.0009765625, %v484_v53 }
  0xf5   : > { %v521_v49 = vmul.f32 0.0009765625, %v498_v51 }
  0xf6   : > { %v612_v58 = vrot.slane %v514_v19, %v1860_v7 }
  0xf7   : > { %v486_v54 = vpop.xlane.xlu0 %485  ;;  %v660_v11 = vrot.slane %v521_v49, %v1858_v6 }
  0xf8   : > { %v500_v10 = vpop.xlane.xlu1 %499  ;;  %v515_v25 = vmul.f32 0.0009765625, %v486_v54 }
  0xf9   : > { %v522_v17 = vmul.f32 0.0009765625, %v500_v10  ;;  %v1886_v10 = vsub.s32 %v650_v36, %v605_v34 }
  0xfa   : > { %v619_v42 = vrot.slane %v515_v25, %v1862_v8 }
  0xfb   : > { %v488_v55 = vpop.xlane.xlu0 %487  ;;  %v664_v37 = vrot.slane %v522_v17, %v1860_v7 }
  0xfc   : > { %v502_v12 = vpop.xlane.xlu1 %501  ;;  %v516_v31 = vmul.f32 0.0009765625, %v488_v55 }
  0xfd   : > { %v523_v23 = vmul.f32 0.0009765625, %v502_v12  ;;  %v665_v53 = vsel %vm613_vm1, %v664_v37, %v660_v11  ;;  %v614_v12 = vsel %vm613_vm1, %v612_v58, %v607_v44 }
  0xfe   : > { %v626_v46 = vrot.slane %v516_v31, %v1864_v13 }
  0xff   : > { %v1844_v56 = vpop.xlane.xlu0 %545  ;;  %v669_v41 = vrot.slane %v523_v23, %v1862_v8 }
 0x100   : > { %v504_v14 = vpop.xlane.xlu1 %503  ;;  %v791_v25 = vrot.slane %v1844_v56, %v1858_v6 }
 0x101   : > { %v524_v30 = vmul.f32 0.0009765625, %v504_v14  ;;  %v670_v55 = vsel %vm620_vm2, %v669_v41, %v665_v53  ;;  %v585_v53 = vld [vmem:[%s2007_s2] sm:$0xf] }
 0x103   : > { %v1848_v60 = vpop.xlane.xlu0 %561  ;;  %v674_v45 = vrot.slane %v524_v30, %v1864_v13 }
 0x104   : > { %v1842_v16 = vpop.xlane.xlu1 %547  ;;  %v830_v31 = vrot.slane %v1848_v60, %v1858_v6 }
 0x105   : > { %v795_v23 = vrot.slane %v1842_v16, %v1860_v7 }
 0x107   : > { %v490_v61 = vpop.xlane.xlu0 %489 }
 0x108   : > { %v1846_v18 = vpop.xlane.xlu1 %563  ;;  %v517_v27 = vmul.f32 0.0009765625, %v490_v61 }
 0x109   : > { %v834_v30 = vrot.slane %v1846_v18, %v1860_v7 }
 0x10a   : > { %v633_v52 = vrot.slane %v517_v27, %v1866_v21 }
 0x10b   : > { %v1852_v24 = vpop.xlane.xlu0 %549 }
 0x10c   : > { %v506_v20 = vpop.xlane.xlu1 %505  ;;  %v800_v56 = vrot.slane %v1852_v24, %v1862_v8  ;;  %v796_v24 = vsel %vm613_vm1, %v795_v23, %v791_v25 }
 0x10d   : > { %v525_v57 = vmul.f32 0.0009765625, %v506_v20  ;;  %v621_v20 = vsel %vm620_vm2, %v619_v42, %v614_v12 }
 0x10e   : > { %v628_v34 = vsel %vm627_vm3, %v626_v46, %v621_v20  ;;  %v801_v58 = vsel %vm620_vm2, %v800_v56, %v796_v24 }
 0x10f   : > { %v492_v28 = vpop.xlane.xlu0 %491  ;;  %v679_v51 = vrot.slane %v525_v57, %v1866_v21  ;;  %v635_v2 = vsel %vm634_vm4, %v633_v52, %v628_v34 }
 0x110   : > { %v1850_v62 = vpop.xlane.xlu1 %565  ;;  %v518_v38 = vmul.f32 0.0009765625, %v492_v28  ;;  %v675_v28 = vsel %vm627_vm3, %v674_v45, %v670_v55 }
 0x111   : > { %v680_v1 = vsel %vm634_vm4, %v679_v51, %v675_v28  ;;  %v839_v16 = vrot.slane %v1850_v62, %v1862_v8 }
 0x112   : > { %v640_v14 = vrot.slane %v518_v38, %v1868_v35 }
 0x113   : > { %v1856_v5 = vpop.xlane.xlu0 %551 }
 0x114   : > { %v508_v26 = vpop.xlane.xlu1 %507  ;;  %v642_v15 = vsel %vm641_vm5, %v640_v14, %v635_v2  ;;  %v805_v18 = vrot.slane %v1856_v5, %v1864_v13 }
 0x115   : > { %v526_v33 = vmul.f32 0.0009765625, %v508_v26 }
 0x116   : > { %v806_v41 = vsel %vm627_vm3, %v805_v18, %v801_v58 }
 0x117   : > { %v494_v48 = vpop.xlane.xlu0 %493  ;;  %v684_v54 = vrot.slane %v526_v33, %v1868_v35 }
 0x118   : > { %v1854_v4 = vpop.xlane.xlu1 %567  ;;  %v519_v43 = vmul.f32 0.0009765625, %v494_v48 }
 0x119   : > { %v685_v3 = vsel %vm641_vm5, %v684_v54, %v680_v1  ;;  %v844_v37 = vrot.slane %v1854_v4, %v1864_v13  ;;  %v835_v4 = vsel %vm613_vm1, %v834_v30, %v830_v31 }
 0x11a   : > { %v647_v22 = vrot.slane %v519_v43, %v1870_v32  ;;  %v840_v13 = vsel %vm620_vm2, %v839_v16, %v835_v4 }
 0x11b   : > { %v1878_v9 = vpop.xlane.xlu0 %553  ;;  %v845_v38 = vsel %vm627_vm3, %v844_v37, %v840_v13 }
 0x11c   : > { %v510_v47 = vpop.xlane.xlu1 %509  ;;  %v649_v48 = vsel %vm648_vm6, %v647_v22, %v642_v15  ;;  %v810_v6 = vrot.slane %v1878_v9, %v1866_v21 }
 0x11d   : > { %v527_v39 = vmul.f32 0.0009765625, %v510_v47 }
 0x11f   : > { %v689_v61 = vrot.slane %v527_v39, %v1870_v32  ;;  %v496_v26 = vpop.xlane.xlu0 %495  ;;  %v811_v39 = vsel %vm634_vm4, %v810_v6, %v806_v41 }
 0x120   : > { %v1876_v59 = vpop.xlane.xlu1 %569  ;;  %v520_v40 = vmul.f32 0.0009765625, %v496_v26 }
 0x121   : > { %v690_v47 = vsel %vm648_vm6, %v689_v61, %v685_v3  ;;  %v849_v60 = vrot.slane %v1876_v59, %v1866_v21 }
 0x122   : > { %v654_v19 = vrot.slane %v520_v40, %v1886_v10 }
 0x123   : > { %v556_v29 = vpop.xlane.xlu0 %555  ;;  %v850_v42 = vsel %vm634_vm4, %v849_v60, %v845_v38 }
 0x124   : > { %v512_v63 = vpop.xlane.xlu1 %511  ;;  %v656_v57 = vsel %vm655_vm7, %v654_v19, %v649_v48  ;;  %v815_v5 = vrot.slane %v556_v29, %v1868_v35 }
 0x125   : > { %v528_v0 = vmul.f32 0.0009765625, %v512_v63 }
 0x126   : > { %v816_v9 = vsel %vm641_vm5, %v815_v5, %v811_v39 }
 0x127   : > { %v694_v17 = vrot.slane %v528_v0, %v1886_v10  ;;  %v558_v7 = vpop.xlane.xlu0 %557 }
 0x128   : > { %v572_v49 = vpop.xlane.xlu1 %571  ;;  %v820_v21 = vrot.slane %v558_v7, %v1870_v32 }
 0x129   : > { %v695_v27 = vsel %vm655_vm7, %v694_v17, %v690_v47  ;;  %v854_v8 = vrot.slane %v572_v49, %v1868_v35 }
 0x12a   : > { %v697_v36 = vsel %vm696_vm8, %v695_v27, %v656_v57  ;;  %v821_v45 = vsel %vm648_vm6, %v820_v21, %v816_v9 }
 0x12b   : > { %1233 = vmatmul.mubr.msk.f32.vlgmr.msra.gmra.mrb[0].mxu0 %vm698_vm9, %v697_v36  ;;  %v560_v59 = vpop.xlane.xlu0 %559  ;;  %v855_v35 = vsel %vm641_vm5, %v854_v8, %v850_v42 }
 0x12c   : > { %v574_v62 = vpop.xlane.xlu1 %573  ;;  %1261 = vmatprep.mubr.msk.f32.mxu0 %vm1482_vm0, %v1483_v50  ;;  %v825_v44 = vrot.slane %v560_v59, %v1886_v10  ;;  %1260 = vmatpush3.msk.msra.mxu0 %vm944_vm10, %v585_v53 }
 0x12d   : > { %v859_v33 = vrot.slane %v574_v62, %v1870_v32 }
 0x12e   : > { %v826_v51 = vsel %vm655_vm7, %v825_v44, %v821_v45 }
 0x12f   : > { %v860_v32 = vsel %vm648_vm6, %v859_v33, %v855_v35 }
 0x130   : > { %v576_v43 = vpop.xlane.xlu1 %575 }
 0x131   : > { %v864_v11 = vrot.slane %v576_v43, %v1886_v10 }
 0x133   : > { %v865_v46 = vsel %vm655_vm7, %v864_v11, %v860_v32 }
 0x134   : > { %v866_v52 = vsel %vm696_vm8, %v865_v46, %v826_v51 }
 0x135   : > { %1252 = vmatmul.mubr.msk.f32.vlgmr.msra.gmra.mrb[0].mxu1 %vm698_vm9, %v866_v52 }
 0x136   : > { %1256 = vmatprep.mubr.msk.f32.mxu1 %vm1482_vm0, %v1483_v50  ;;  %1255 = vmatpush3.msk.msra.mxu1 %vm944_vm10, %v585_v53 }
 0x1fe   : > { %v767_v10 = vpop.f32.mrb[0].mxu0 }
 0x1ff   : > { %v771_v12 = vmax.f32 %v767_v10, 0.0  ;;  %v1234_v54 = vpop.f32.mrb[1].mxu0 }
 0x201   : > { %1262 = vmatmul.mubr.msk.f32.vlgmr.msra.gmra.mrb[2].mxu0 %vm940_vm11, %v771_v12 }
 0x208   : > { %v935_v14 = vpop.f32.mrb[0].mxu1 }
 0x209   : > { %v939_v55 = vmax.f32 %v935_v14, 0.0  ;;  %v1253_v20 = vpop.f32.mrb[1].mxu1 }
 0x20b   : > { %1257 = vmatmul.mubr.msk.f32.vlgmr.msra.gmra.mrb[2].mxu1 %vm940_vm11, %v939_v55 }
 0x2d4   : > { %v1087_v61 = vpop.f32.mrb[2].mxu0 }
 0x2d5   : > { %v1263_v22 = vpop.f32.mrb[3].mxu0 }
 0x2de   : > { %v1014_v63 = vpop.f32.mrb[2].mxu1 }
 0x2df   : > { %v1088_v50 = vadd.f32 %v1087_v61, %v1014_v63  ;;  %v1258_v26 = vpop.f32.mrb[3].mxu1 }
 0x2e1   : > { %v1188_v28 = vmul.f32 -1.442695, %v1088_v50 }
 0x2e3   : > { %1359 = vpow2.f32 %v1188_v28 }
 0x2ed   : > { %v1360_v34 = vpop.eup %1359 }
 0x2ee   : > { %v1094_v0 = vadd.f32 1.0, %v1360_v34 }
 0x2f0   : > { %1361 = vrcp.f32 %v1094_v0 }
 0x2fa   : > { %v1362_v40 = vpop.eup %1361 }
 0x2fb   : > { %1098 = vst.msk [vmem:[#allocation7] sm:$0x3] %vm1097_vm12, %v1362_v40 }
 0x2fc PF: > { %p1961_p9 = scmp.eq.s32.totalorder %s1172_s18, 3  ;;  %s1484_s10 = smov [#allocation7]  }
 0x2fd   : > { %s1108_s15 = sshll.u32 %s1484_s10, 4  ;;  %s1109_s15 = int_to_ptr.vmem [resolvable:$true] %s1108_s15 }
 0x2fe   : > { %s1393_s23 = scalar_lea.vmem %s1109_s15, 32  ;;  %p1400_p11 = scmp.lt.s32.totalorder %s1109_s15, %s1109_s15 }
 0x2ff   : > { %p1394_p5 = scmp.ne.s32.totalorder %s1109_s15, %s1393_s23  ;;  %p1401_p13 = scmp.lt.s32.totalorder %s1393_s23, %s1393_s23 }
 0x301   : > { %p1395_p6 = pnand %p1394_p5, %p1961_p9  ;;  %p1402_p1 = por %p1401_p13, %p1400_p11 }
 0x303   : > { %p1396_p8 = pneg %p1395_p6 }
 0x305   : > { %p1403_p2 = pnand %p1402_p1, %p1396_p8 }
 0x307   : > { %1406 = shalt.err (!%p1403_p2)
}
 0x308   : > { %s1407_s18 = scalar_lea.hbm %s2008_s3, 32 }
 0x309   : > { %p1408_p3 = scmp.ne.s32.totalorder %s2008_s3, %s1407_s18  ;;  %p1413_p4 = scmp.lt.u32.totalorder %s1407_s18, %s2008_s3 }
 0x30b   : > { %p1409_p12 = pnand %p1408_p3, %p1961_p9 }
 0x30d   : > { %p1410_p0 = pneg %p1409_p12 }
 0x30f   : > { %p1415_p10 = pnand %p1413_p4, %p1410_p0 }
 0x311   : > { %1418 = shalt.err (!%p1415_p10)
}
 0x312   : > { %1292 = dma.vmem_to_hbm [thread:$0]  (%p1961_p9), %s1109_s15, 32, %s2008_s3, [#allocation6]  }
 0x313   : > { %1448 = dma.done.wait (%p1961_p9), [#allocation6], 32  }
 0x314   : > { %1450 = vsyncadd (%p1961_p9), [#allocation6], 4294967264 }
 0x315 PF: > { %s17_s17 = sadd.s32 1, %s1473_s17   ;;  %s2023_s12 = smov %s1457_s13 }
 0x316   : > { %p14_p7 = scmp.ge.s32.totalorder %s17_s17, 6   ;;  %s2024_s13 = smov %s1461_s14 }
 0x317   : > { %s2025_s14 = smov %s1556_s24  ;;  %s2026_s15 = smov %s1469_s16 }
 0x318   : > { %s2027_s16 = smov %s2029_s19  ;;  %16 = sbr.rel (!%p14_p7) target bundleno = 5 (0x5), region = 78 }
 0x31f   :  { %1121 = vsyncpa [#allocation5], 1 }
 0x320   :  { %1123 = vsyncpa [#allocation5 + $0x1], 1 }
 0x321   :  { %1124 = vsyncpa [#allocation6], 1 }
 0x322   :  { %1126 = vsyncpa [#allocation6 + $0x1], 1 }

</bundles_post_ra>
